<compile_context>
chip_gen: v7x
topology: tpu7x:2x2x1
jax: 0.10.0
libtpu: 0.0.40
codegen_flags: <defaults>
</compile_context>

<pallas_src>
import functools

import jax
import jax.numpy as jnp
from jax.experimental import pallas as pl
from jax.experimental.pallas import tpu as pltpu


def _round_up(v, m):
    return ((v + m - 1) // m) * m


def _temporal_block_kernel(*refs, K, dilation, pad, TL, has_downsample,
                           conv1_per_tap, conv2_per_tap):
    # refs: x, w1, b1, w2, b2, [wd, bd], out, [x_halo, h1_halo]
    x_ref, w1_ref, b1_ref, w2_ref, b2_ref = refs[:5]
    idx = 5
    if has_downsample:
        wd_ref, bd_ref = refs[5], refs[6]
        idx = 7
    out_ref = refs[idx]
    if pad > 0:
        xh_ref, h1h_ref = refs[idx + 1], refs[idx + 2]

    l = pl.program_id(1)

    if pad > 0:
        # First tile of every batch element: the causal left context is exact
        # zeros (replaces both the host-side left pad and the old iota mask).
        @pl.when(l == 0)
        def _():
            xh_ref[...] = jnp.zeros_like(xh_ref)
            h1h_ref[...] = jnp.zeros_like(h1h_ref)

    x_raw = x_ref[...]                       # (C_in, TL), input dtype (f32)
    x_bf = x_raw.astype(jnp.bfloat16)        # bf16 MXU operand (cast in-kernel)

    def causal_conv(w_ref, cur, halo_ref, c_in, per_tap):
        """Dilated causal conv over [halo | cur] -> (C_out, TL) f32."""
        if pad > 0:
            win = jnp.concatenate([halo_ref[...], cur], axis=1)  # (c_in, pad+TL)
        else:
            win = cur
        if per_tap:
            # Per-tap accumulation: avoids materializing the (K*c_in, TL)
            # im2col operand (preferred for wide channels / v7x's 64 MiB VMEM).
            acc = jnp.zeros((w_ref.shape[0], TL), jnp.float32)
            for k in range(K):
                acc = acc + jnp.dot(
                    w_ref[:, k * c_in:(k + 1) * c_in],
                    win[:, k * dilation:k * dilation + TL],
                    preferred_element_type=jnp.float32)
            return acc
        # Fused im2col: one MXU matmul over the folded K*c_in contraction dim.
        cols = jnp.concatenate(
            [win[:, k * dilation:k * dilation + TL] for k in range(K)], axis=0)
        return jnp.dot(w_ref[...], cols, preferred_element_type=jnp.float32)

    # ---- conv1 (dilated causal) + ReLU; bias/ReLU in f32 ----
    h1 = causal_conv(w1_ref, x_bf, xh_ref if pad > 0 else None,
                     x_bf.shape[0], conv1_per_tap)
    h1 = jnp.maximum(h1 + b1_ref[...], 0.0)          # (C_out, TL) f32
    h1_bf = h1.astype(jnp.bfloat16)

    # ---- conv2 (dilated causal) + ReLU ----
    h2 = causal_conv(w2_ref, h1_bf, h1h_ref if pad > 0 else None,
                     h1_bf.shape[0], conv2_per_tap)
    h2 = jnp.maximum(h2 + b2_ref[...], 0.0)           # (C_out, TL) f32

    # ---- residual branch ----
    if has_downsample:
        res = jnp.dot(wd_ref[...], x_bf,
                      preferred_element_type=jnp.float32) + bd_ref[...]
    else:
        res = x_raw.astype(jnp.float32)               # identity stays f32

    out_ref[...] = jnp.maximum(h2 + res, 0.0).astype(out_ref.dtype)

    if pad > 0:
        # Carry the last `pad` columns of x and relu(conv1) to the next tile.
        xh_ref[...] = x_bf[:, TL - pad:]
        h1h_ref[...] = h1_bf[:, TL - pad:]


def _pick_tile_and_vmem(C_in, C_out, K, pad, L, out_bytes, max_l_tile):
    """Pick the L tile first (biggest that fits a VMEM budget), then the limit."""
    def est(tl):
        blocks = 2 * C_in * tl * 4 + 2 * C_out * tl * out_bytes   # dbl-buffered
        weights = 2 * 2 * (C_out * K * (C_in + C_out) + C_out * C_in) + 6 * C_out * 4
        halos = 2 * (C_in + C_out) * max(pad, 1)
        live = tl * (2 * (K + 1) * (C_in + C_out) + 4 * (2 * C_out + C_in))
        return blocks + weights + halos + live

    budget = 40 << 20    # fits v7x's 64 MiB/TC with headroom; trivial on v5e/v6e
    tl = 128
    for cand in (1024, 512, 256, 128):
        if cand <= max_l_tile and est(cand) <= budget:
            tl = cand
            break
    tl = min(tl, _round_up(L, 128))                    # don't over-pad short seqs
    if pad > 0:
        tl = max(tl, _round_up(pad, 128))              # halo must fit in one tile
    vmem = min(48 << 20, max(32 << 20, int(est(tl) * 1.25)))
    return tl, vmem


def temporal_block_forward(x, params, *, kernel_size, dilation, padding,
                           out_dtype=jnp.bfloat16, max_l_tile=1024,
                           per_tap=None):
    """TemporalBlock forward (eval mode). x: (N, C_in, L) float32."""
    N, C_in, L = x.shape
    w1, b1, w2, b2, wd, bd = params
    C_out = w1.shape[0]
    K = kernel_size
    pad = padding
    has_downsample = wd is not None
    if not has_downsample:
        assert C_in == C_out, "identity residual requires n_inputs == n_outputs"

    # Causal TCN convention (symmetric pad + Chomp1d == left pad, same length).
    assert padding == (kernel_size - 1) * dilation, (
        "kernel assumes padding == (kernel_size - 1) * dilation (standard TCN)")

    out_bytes = jnp.dtype(out_dtype).itemsize
    TL, vmem_limit = _pick_tile_and_vmem(C_in, C_out, K, pad, L, out_bytes,
                                         max_l_tile)
    Lp = _round_up(L, TL)
    n_l = Lp // TL

    # Only a right pad up to the tile multiple (skipped if already aligned);
    # no left pad and no host-side bf16 cast pass.
    x_in = x if Lp == L else jnp.pad(x, ((0, 0), (0, 0), (0, Lp - L)))

    # im2col weight layout: taps folded into the contraction dim; bf16 operands.
    w1f = jnp.transpose(w1, (0, 2, 1)).reshape(C_out, K * C_in).astype(jnp.bfloat16)
    w2f = jnp.transpose(w2, (0, 2, 1)).reshape(C_out, K * C_out).astype(jnp.bfloat16)

    if per_tap is None:
        conv1_per_tap = K * C_in > 512
        conv2_per_tap = K * C_out > 512
    else:
        conv1_per_tap = conv2_per_tap = bool(per_tap)

    kernel = functools.partial(
        _temporal_block_kernel, K=K, dilation=dilation, pad=pad, TL=TL,
        has_downsample=has_downsample, conv1_per_tap=conv1_per_tap,
        conv2_per_tap=conv2_per_tap)

    const2 = lambda n, l: (0, 0)
    in_specs = [
        pl.BlockSpec((None, C_in, TL), lambda n, l: (n, 0, l)),
        pl.BlockSpec((C_out, K * C_in), const2),
        pl.BlockSpec((C_out, 1), const2),
        pl.BlockSpec((C_out, K * C_out), const2),
        pl.BlockSpec((C_out, 1), const2),
    ]
    operands = [x_in, w1f, b1.astype(jnp.float32), w2f, b2.astype(jnp.float32)]
    if has_downsample:
        in_specs += [pl.BlockSpec((C_out, C_in), const2),
                     pl.BlockSpec((C_out, 1), const2)]
        operands += [wd.reshape(C_out, C_in).astype(jnp.bfloat16),
                     bd.astype(jnp.float32)]

    scratch_shapes = []
    if pad > 0:
        scratch_shapes = [pltpu.VMEM((C_in, pad), jnp.bfloat16),
                          pltpu.VMEM((C_out, pad), jnp.bfloat16)]

    out = pl.pallas_call(
        kernel,
        out_shape=jax.ShapeDtypeStruct((N, C_out, Lp), out_dtype),
        grid_spec=pltpu.PrefetchScalarGridSpec(
            num_scalar_prefetch=0,
            grid=(N, n_l),
            in_specs=in_specs,
            out_specs=pl.BlockSpec((None, C_out, TL), lambda n, l: (n, 0, l)),
            scratch_shapes=scratch_shapes,
        ),
        compiler_params=pltpu.CompilerParams(
            # l tiles carry the causal halo -> sequential; batch is parallel
            # (megacore shards over batch).
            dimension_semantics=("parallel", "arbitrary"),
            vmem_limit_bytes=vmem_limit),
    )(*operands)

    return out if Lp == L else out[:, :, :L]


def apply_weight_norm(v, g):
    """PyTorch weight_norm (dim=0): w[o] = g[o] * v[o] / ||v[o]||."""
    norm = jnp.sqrt(jnp.sum(v * v, axis=tuple(range(1, v.ndim)), keepdims=True))
    return g.reshape((-1,) + (1,) * (v.ndim - 1)) * v / norm


def make_params(key, n_inputs, n_outputs, kernel_size):
    ks = jax.random.split(key, 8)
    # conv1 / conv2 weights: normal(0, 0.01) per TemporalBlock.init_weights
    v1 = 0.01 * jax.random.normal(ks[0], (n_outputs, n_inputs, kernel_size), jnp.float32)
    v2 = 0.01 * jax.random.normal(ks[1], (n_outputs, n_outputs, kernel_size), jnp.float32)
    # weight_norm g initialized to ||v|| (PyTorch weight_norm default)
    g1 = jnp.sqrt(jnp.sum(v1 * v1, axis=(1, 2)))
    g2 = jnp.sqrt(jnp.sum(v2 * v2, axis=(1, 2)))
    w1 = apply_weight_norm(v1, g1)
    w2 = apply_weight_norm(v2, g2)
    # Conv1d default bias init: U(-1/sqrt(fan_in), 1/sqrt(fan_in))
    bnd1 = 1.0 / jnp.sqrt(n_inputs * kernel_size)
    bnd2 = 1.0 / jnp.sqrt(n_outputs * kernel_size)
    b1 = jax.random.uniform(ks[2], (n_outputs, 1), jnp.float32, -bnd1, bnd1)
    b2 = jax.random.uniform(ks[3], (n_outputs, 1), jnp.float32, -bnd2, bnd2)
    if n_inputs != n_outputs:
        wd = 0.01 * jax.random.normal(ks[4], (n_outputs, n_inputs), jnp.float32)
        bndd = 1.0 / jnp.sqrt(n_inputs)
        bd = jax.random.uniform(ks[5], (n_outputs, 1), jnp.float32, -bndd, bndd)
    else:
        wd, bd = None, None
    return w1, b1, w2, b2, wd, bd


def reference_forward(x, params, *, kernel_size, dilation, padding):
    """Pure-JAX f32 reference matching the PyTorch forward (eval mode)."""
    w1, b1, w2, b2, wd, bd = params
    N, C_in, L = x.shape

    def causal_conv(inp, w, b):
        ip = jnp.pad(inp, ((0, 0), (0, 0), (padding, 0)))
        out = b[None, :, :]
        for k in range(kernel_size):
            out = out + jnp.einsum('oi,nil->nol', w[:, :, k],
                                   ip[:, :, k * dilation:k * dilation + L])
        return out

    h1 = jax.nn.relu(causal_conv(x, w1, b1))
    h2 = jax.nn.relu(causal_conv(h1, w2, b2))
    if wd is not None:
        res = jnp.einsum('oi,nil->nol', wd, x) + bd[None, :, :]
    else:
        res = x
    return jax.nn.relu(h2 + res)


def _check(name, out, ref, atol=2e-2, rtol=2e-2):
    out_f = out.astype(jnp.float32)
    err = float(jnp.max(jnp.abs(out_f - ref)))
    assert jnp.allclose(out_f, ref, atol=atol, rtol=rtol), (
        f"mismatch vs reference ({name}), max abs err {err:.3e}")


if __name__ == "__main__":
    # Small config: n_inputs=4, n_outputs=8, kernel_size=3, stride=1,
    # dilation=2, padding=(kernel_size-1)*dilation=4, batch=2, seq_len=16.
    n_inputs, n_outputs, kernel_size = 4, 8, 3
    dilation = 2
    padding = (kernel_size - 1) * dilation
    N, L = 2, 16

    key = jax.random.PRNGKey(0)
    kx, kp, kp2, kx3, kp3 = jax.random.split(key, 5)

    # --- downsample path (n_inputs != n_outputs), default bf16 output ---
    x = jax.random.normal(kx, (N, n_inputs, L), jnp.float32)
    params = make_params(kp, n_inputs, n_outputs, kernel_size)
    out = temporal_block_forward(x, params, kernel_size=kernel_size,
                                 dilation=dilation, padding=padding)
    out = jax.block_until_ready(out)
    ref = reference_forward(x, params, kernel_size=kernel_size,
                            dilation=dilation, padding=padding)
    assert out.shape == (N, n_outputs, L)
    _check("downsample path", out, ref)

    # --- identity-residual path (n_inputs == n_outputs, no dummy wd/bd) ---
    x2 = jax.random.normal(kx, (N, n_outputs, L), jnp.float32)
    params2 = make_params(kp2, n_outputs, n_outputs, kernel_size)
    out2 = jax.block_until_ready(
        temporal_block_forward(x2, params2, kernel_size=kernel_size,
                               dilation=dilation, padding=padding))
    ref2 = reference_forward(x2, params2, kernel_size=kernel_size,
                             dilation=dilation, padding=padding)
    _check("identity path", out2, ref2)

    # --- multi-tile halo carry + partial last tile (L=300, TL forced to 128),
    #     per-tap accumulation path, f32 output ---
    L3, dil3 = 300, 4
    pad3 = (kernel_size - 1) * dil3
    x3 = jax.random.normal(kx3, (N, n_inputs, L3), jnp.float32)
    params3 = make_params(kp3, n_inputs, n_outputs, kernel_size)
    out3 = jax.block_until_ready(
        temporal_block_forward(x3, params3, kernel_size=kernel_size,
                               dilation=dil3, padding=pad3,
                               out_dtype=jnp.float32, max_l_tile=128,
                               per_tap=True))
    ref3 = reference_forward(x3, params3, kernel_size=kernel_size,
                             dilation=dil3, padding=pad3)
    assert out3.shape == (N, n_outputs, L3)
    _check("multi-tile per-tap path", out3, ref3)

    # --- same data through the fused-im2col path (default) ---
    out3b = jax.block_until_ready(
        temporal_block_forward(x3, params3, kernel_size=kernel_size,
                               dilation=dil3, padding=pad3,
                               max_l_tile=128, per_tap=False))
    _check("multi-tile fused path", out3b, ref3)

    print("KERNEL_OK")
</pallas_src>

<mosaic_0001>
module attributes {stable_mosaic.version = 11 : i64} {
  func.func @_temporal_block_kernel(%arg0: i32, %arg1: i32, %arg2: memref<1x4x128xf32, #tpu.memory_space<vmem>>, %arg3: memref<8x12xbf16, #tpu.memory_space<vmem>>, %arg4: memref<8x1xf32, #tpu.memory_space<vmem>>, %arg5: memref<8x24xbf16, #tpu.memory_space<vmem>>, %arg6: memref<8x1xf32, #tpu.memory_space<vmem>>, %arg7: memref<8x4xbf16, #tpu.memory_space<vmem>>, %arg8: memref<8x1xf32, #tpu.memory_space<vmem>>, %arg9: memref<1x8x128xbf16, #tpu.memory_space<vmem>>, %arg10: memref<4x4xbf16, #tpu.memory_space<vmem>>, %arg11: memref<8x4xbf16, #tpu.memory_space<vmem>>) attributes {dimension_semantics = [#tpu.dimension_semantics<parallel>, #tpu.dimension_semantics<arbitrary>], iteration_bounds = array<i64: 2, 1>, scalar_prefetch = 0 : i64, scratch_operands = 2 : i64, tpu.core_type = #tpu.core_type<tc>, window_params = [{transform_indices = @transform_0, window_bounds = array<i64: 1, 4, 128>}, {pipeline_mode = #tpu.pipeline_mode<synchronous>, transform_indices = @transform_1, window_bounds = array<i64: 8, 12>}, {pipeline_mode = #tpu.pipeline_mode<synchronous>, transform_indices = @transform_2, window_bounds = array<i64: 8, 1>}, {pipeline_mode = #tpu.pipeline_mode<synchronous>, transform_indices = @transform_3, window_bounds = array<i64: 8, 24>}, {pipeline_mode = #tpu.pipeline_mode<synchronous>, transform_indices = @transform_4, window_bounds = array<i64: 8, 1>}, {pipeline_mode = #tpu.pipeline_mode<synchronous>, transform_indices = @transform_5, window_bounds = array<i64: 8, 4>}, {pipeline_mode = #tpu.pipeline_mode<synchronous>, transform_indices = @transform_6, window_bounds = array<i64: 8, 1>}, {transform_indices = @transform_7, window_bounds = array<i64: 1, 8, 128>}]} {
    %c0_i32 = arith.constant 0 : i32
    %0 = arith.cmpi eq, %arg1, %c0_i32 : i32
    %1 = arith.extui %0 : i1 to i32
    %c0_i32_0 = arith.constant 0 : i32
    %2 = arith.cmpi ne, %1, %c0_i32_0 : i32
    scf.if %2 {
      %cst_31 = arith.constant 0.000000e+00 : bf16
      %49 = vector.broadcast %cst_31 : bf16 to vector<4x4xbf16>
      %c0_32 = arith.constant 0 : index
      %c0_33 = arith.constant 0 : index
      %50 = vector.load %arg10[%c0_32, %c0_33] : memref<4x4xbf16, #tpu.memory_space<vmem>>, vector<4x4xbf16>
      tpu.vector_store %arg10[%c0_32, %c0_33], %49 {strides = array<i32>} : memref<4x4xbf16, #tpu.memory_space<vmem>>, vector<4x4xbf16>,
      %cst_34 = arith.constant 0.000000e+00 : bf16
      %51 = vector.broadcast %cst_34 : bf16 to vector<8x4xbf16>
      %c0_35 = arith.constant 0 : index
      %c0_36 = arith.constant 0 : index
      %52 = vector.load %arg11[%c0_35, %c0_36] : memref<8x4xbf16, #tpu.memory_space<vmem>>, vector<8x4xbf16>
      tpu.vector_store %arg11[%c0_35, %c0_36], %51 {strides = array<i32>} : memref<8x4xbf16, #tpu.memory_space<vmem>>, vector<8x4xbf16>,
    } else {
    }
    %c0 = arith.constant 0 : index
    %c0_1 = arith.constant 0 : index
    %c0_2 = arith.constant 0 : index
    %3 = vector.load %arg2[%c0, %c0_1, %c0_2] : memref<1x4x128xf32, #tpu.memory_space<vmem>>, vector<1x4x128xf32>
    %4 = vector.shape_cast %3 : vector<1x4x128xf32> to vector<4x128xf32>
    %5 = arith.truncf %4 : vector<4x128xf32> to vector<4x128xbf16>
    %c0_3 = arith.constant 0 : index
    %c0_4 = arith.constant 0 : index
    %6 = vector.load %arg10[%c0_3, %c0_4] : memref<4x4xbf16, #tpu.memory_space<vmem>>, vector<4x4xbf16>
    %7 = tpu.concatenate %6, %5 in 1 : vector<4x4xbf16>, vector<4x128xbf16> -> vector<4x132xbf16>
    %8 = vector.extract_strided_slice %7 {offsets = [0, 0], sizes = [4, 128], strides = [1, 1]} : vector<4x132xbf16> to vector<4x128xbf16>
    %9 = vector.extract_strided_slice %7 {offsets = [0, 2], sizes = [4, 128], strides = [1, 1]} : vector<4x132xbf16> to vector<4x128xbf16>
    %10 = vector.extract_strided_slice %7 {offsets = [0, 4], sizes = [4, 128], strides = [1, 1]} : vector<4x132xbf16> to vector<4x128xbf16>
    %11 = tpu.concatenate %8, %9, %10 in 0 : vector<4x128xbf16>, vector<4x128xbf16>, vector<4x128xbf16> -> vector<12x128xbf16>
    %c0_5 = arith.constant 0 : index
    %c0_6 = arith.constant 0 : index
    %12 = vector.load %arg3[%c0_5, %c0_6] : memref<8x12xbf16, #tpu.memory_space<vmem>>, vector<8x12xbf16>
    %cst = arith.constant dense<0.000000e+00> : vector<8x128xf32>
    %13 = tpu.matmul %12, %11, %cst {dimension_numbers = #tpu.dot_dimension_numbers<[1], [0], [0], [1], [0, 0, 1, 1], [], []>} : vector<8x12xbf16>, vector<12x128xbf16>, vector<8x128xf32> -> vector<8x128xf32>
    %c0_7 = arith.constant 0 : index
    %c0_8 = arith.constant 0 : index
    %14 = vector.load %arg4[%c0_7, %c0_8] : memref<8x1xf32, #tpu.memory_space<vmem>>, vector<8x1xf32>
    %15 = vector.broadcast %14 : vector<8x1xf32> to vector<8x128xf32>
    %16 = arith.addf %13, %15 : vector<8x128xf32>
    %cst_9 = arith.constant 0.000000e+00 : f32
    %17 = vector.broadcast %cst_9 : f32 to vector<8x128xf32>
    %18 = arith.maximumf %16, %17 : vector<8x128xf32>
    %19 = arith.truncf %18 : vector<8x128xf32> to vector<8x128xbf16>
    %c0_10 = arith.constant 0 : index
    %c0_11 = arith.constant 0 : index
    %20 = vector.load %arg11[%c0_10, %c0_11] : memref<8x4xbf16, #tpu.memory_space<vmem>>, vector<8x4xbf16>
    %21 = tpu.concatenate %20, %19 in 1 : vector<8x4xbf16>, vector<8x128xbf16> -> vector<8x132xbf16>
    %22 = vector.extract_strided_slice %21 {offsets = [0, 0], sizes = [8, 128], strides = [1, 1]} : vector<8x132xbf16> to vector<8x128xbf16>
    %23 = vector.extract_strided_slice %21 {offsets = [0, 2], sizes = [8, 128], strides = [1, 1]} : vector<8x132xbf16> to vector<8x128xbf16>
    %24 = vector.extract_strided_slice %21 {offsets = [0, 4], sizes = [8, 128], strides = [1, 1]} : vector<8x132xbf16> to vector<8x128xbf16>
    %25 = tpu.concatenate %22, %23, %24 in 0 : vector<8x128xbf16>, vector<8x128xbf16>, vector<8x128xbf16> -> vector<24x128xbf16>
    %c0_12 = arith.constant 0 : index
    %c0_13 = arith.constant 0 : index
    %26 = vector.load %arg5[%c0_12, %c0_13] : memref<8x24xbf16, #tpu.memory_space<vmem>>, vector<8x24xbf16>
    %cst_14 = arith.constant dense<0.000000e+00> : vector<8x128xf32>
    %27 = tpu.matmul %26, %25, %cst_14 {dimension_numbers = #tpu.dot_dimension_numbers<[1], [0], [0], [1], [0, 0, 1, 1], [], []>} : vector<8x24xbf16>, vector<24x128xbf16>, vector<8x128xf32> -> vector<8x128xf32>
    %c0_15 = arith.constant 0 : index
    %c0_16 = arith.constant 0 : index
    %28 = vector.load %arg6[%c0_15, %c0_16] : memref<8x1xf32, #tpu.memory_space<vmem>>, vector<8x1xf32>
    %29 = vector.broadcast %28 : vector<8x1xf32> to vector<8x128xf32>
    %30 = arith.addf %27, %29 : vector<8x128xf32>
    %cst_17 = arith.constant 0.000000e+00 : f32
    %31 = vector.broadcast %cst_17 : f32 to vector<8x128xf32>
    %32 = arith.maximumf %30, %31 : vector<8x128xf32>
    %c0_18 = arith.constant 0 : index
    %c0_19 = arith.constant 0 : index
    %33 = vector.load %arg7[%c0_18, %c0_19] : memref<8x4xbf16, #tpu.memory_space<vmem>>, vector<8x4xbf16>
    %cst_20 = arith.constant dense<0.000000e+00> : vector<8x128xf32>
    %34 = tpu.matmul %33, %5, %cst_20 {dimension_numbers = #tpu.dot_dimension_numbers<[1], [0], [0], [1], [0, 0, 1, 1], [], []>} : vector<8x4xbf16>, vector<4x128xbf16>, vector<8x128xf32> -> vector<8x128xf32>
    %c0_21 = arith.constant 0 : index
    %c0_22 = arith.constant 0 : index
    %35 = vector.load %arg8[%c0_21, %c0_22] : memref<8x1xf32, #tpu.memory_space<vmem>>, vector<8x1xf32>
    %36 = vector.broadcast %35 : vector<8x1xf32> to vector<8x128xf32>
    %37 = arith.addf %34, %36 : vector<8x128xf32>
    %38 = arith.addf %32, %37 : vector<8x128xf32>
    %cst_23 = arith.constant 0.000000e+00 : f32
    %39 = vector.broadcast %cst_23 : f32 to vector<8x128xf32>
    %40 = arith.maximumf %38, %39 : vector<8x128xf32>
    %41 = arith.truncf %40 : vector<8x128xf32> to vector<8x128xbf16>
    %c0_24 = arith.constant 0 : index
    %c0_25 = arith.constant 0 : index
    %c0_26 = arith.constant 0 : index
    %42 = vector.load %arg9[%c0_24, %c0_25, %c0_26] : memref<1x8x128xbf16, #tpu.memory_space<vmem>>, vector<1x8x128xbf16>
    %43 = vector.shape_cast %42 : vector<1x8x128xbf16> to vector<8x128xbf16>
    %44 = vector.shape_cast %41 : vector<8x128xbf16> to vector<1x8x128xbf16>
    tpu.vector_store %arg9[%c0_24, %c0_25, %c0_26], %44 {strides = array<i32>} : memref<1x8x128xbf16, #tpu.memory_space<vmem>>, vector<1x8x128xbf16>,
    %45 = vector.extract_strided_slice %5 {offsets = [0, 124], sizes = [4, 4], strides = [1, 1]} : vector<4x128xbf16> to vector<4x4xbf16>
    %c0_27 = arith.constant 0 : index
    %c0_28 = arith.constant 0 : index
    %46 = vector.load %arg10[%c0_27, %c0_28] : memref<4x4xbf16, #tpu.memory_space<vmem>>, vector<4x4xbf16>
    tpu.vector_store %arg10[%c0_27, %c0_28], %45 {strides = array<i32>} : memref<4x4xbf16, #tpu.memory_space<vmem>>, vector<4x4xbf16>,
    %47 = vector.extract_strided_slice %19 {offsets = [0, 124], sizes = [8, 4], strides = [1, 1]} : vector<8x128xbf16> to vector<8x4xbf16>
    %c0_29 = arith.constant 0 : index
    %c0_30 = arith.constant 0 : index
    %48 = vector.load %arg11[%c0_29, %c0_30] : memref<8x4xbf16, #tpu.memory_space<vmem>>, vector<8x4xbf16>
    tpu.vector_store %arg11[%c0_29, %c0_30], %47 {strides = array<i32>} : memref<8x4xbf16, #tpu.memory_space<vmem>>, vector<8x4xbf16>,
    return
  }
  func.func @transform_0(%arg0: i32, %arg1: i32) -> (i32, i32, i32) {
    %c0_i32 = arith.constant 0 : i32
    %c0_i32_0 = arith.constant 0 : i32
    return %arg0, %c0_i32, %arg1 : i32, i32, i32
  }
  func.func @transform_1(%arg0: i32, %arg1: i32) -> (i32, i32) {
    %c0_i32 = arith.constant 0 : i32
    %c0_i32_0 = arith.constant 0 : i32
    %c0_i32_1 = arith.constant 0 : i32
    return %c0_i32, %c0_i32_0 : i32, i32
  }
  func.func @transform_2(%arg0: i32, %arg1: i32) -> (i32, i32) {
    %c0_i32 = arith.constant 0 : i32
    %c0_i32_0 = arith.constant 0 : i32
    %c0_i32_1 = arith.constant 0 : i32
    return %c0_i32, %c0_i32_0 : i32, i32
  }
  func.func @transform_3(%arg0: i32, %arg1: i32) -> (i32, i32) {
    %c0_i32 = arith.constant 0 : i32
    %c0_i32_0 = arith.constant 0 : i32
    %c0_i32_1 = arith.constant 0 : i32
    return %c0_i32, %c0_i32_0 : i32, i32
  }
  func.func @transform_4(%arg0: i32, %arg1: i32) -> (i32, i32) {
    %c0_i32 = arith.constant 0 : i32
    %c0_i32_0 = arith.constant 0 : i32
    %c0_i32_1 = arith.constant 0 : i32
    return %c0_i32, %c0_i32_0 : i32, i32
  }
  func.func @transform_5(%arg0: i32, %arg1: i32) -> (i32, i32) {
    %c0_i32 = arith.constant 0 : i32
    %c0_i32_0 = arith.constant 0 : i32
    %c0_i32_1 = arith.constant 0 : i32
    return %c0_i32, %c0_i32_0 : i32, i32
  }
  func.func @transform_6(%arg0: i32, %arg1: i32) -> (i32, i32) {
    %c0_i32 = arith.constant 0 : i32
    %c0_i32_0 = arith.constant 0 : i32
    %c0_i32_1 = arith.constant 0 : i32
    return %c0_i32, %c0_i32_0 : i32, i32
  }
  func.func @transform_7(%arg0: i32, %arg1: i32) -> (i32, i32, i32) {
    %c0_i32 = arith.constant 0 : i32
    %c0_i32_0 = arith.constant 0 : i32
    return %arg0, %c0_i32, %arg1 : i32, i32, i32
  }
}

</mosaic_0001>

<bundles_post_ra>
// kernel: tpu_custom_call.1
= control target key start
LH: loop header
LB: loop body
LE: loop exit
PB: predicated region body
PF: predicated region fallthrough
CT: control target
= control target key end

     0   :  { %12 = vsyncpa [#allocation5], 0  ;;  %s1045_s0 = inlined_call_operand.vmem [shape: f32[2,4,128], index: 0, kind: input, shape index: {}]   ;;  %s1046_s1 = inlined_call_operand.vmem [shape: bf16[8,12], index: 1, kind: input, shape index: {}]   ;;  %s1047_s2 = inlined_call_operand.vmem [shape: f32[8,1], index: 2, kind: input, shape index: {}]   ;;  %s1048_s3 = inlined_call_operand.vmem [shape: bf16[8,24], index: 3, kind: input, shape index: {}]   ;;  %s1049_s4 = inlined_call_operand.vmem [shape: f32[8,1], index: 4, kind: input, shape index: {}]   ;;  %s1050_s5 = inlined_call_operand.vmem [shape: bf16[8,4], index: 5, kind: input, shape index: {}]   ;;  %s1051_s6 = inlined_call_operand.vmem [shape: f32[8,1], index: 6, kind: input, shape index: {}]   ;;  %s1052_s7 = inlined_call_operand.hbm [shape: bf16[2,8,128], index: 7, kind: output, shape index: {}]  }
   0x1   :  { %14 = vsyncpa [#allocation5 + $0x1], 0  ;;  %s872_s24 = smov 0   ;;  %s874_s25 = smov 0  }
   0x2   :  { %s876_s26 = smov 0   ;;  %s878_s27 = smov 0  }
   0x3   :  { %s880_s28 = smov 0   ;;  %s882_s29 = smov 0  }
   0x4 LB: > { %s637_s30 = sadd.s32 4294967295, %s822_s29   ;;  %s638_s8 = sadd.s32 4294967294, %s822_s29   ;;  %s822_s29 = sphi %s882_s29, %s20_s29   ;;  %s818_s28 = sphi %s880_s28, %s1059_s28   ;;  %s814_s27 = sphi %s878_s27, %s1058_s27   ;;  %s810_s26 = sphi %s876_s26, %s1057_s26   ;;  %s806_s25 = sphi %s874_s25, %s1056_s25   ;;  %s802_s24 = sphi %s872_s24, %s1055_s24  }
   0x5   : > { %s32_s9 = sadd.s32 1, %s818_s28  ;;  %s195_s10 = sadd.s32 1, %s810_s26 }
   0x6   : > { %p34_p0 = scmp.ge.s32.totalorder %s32_s9, 2  ;;  %p205_p1 = scmp.ne.s32.totalorder %s810_s26, %s806_s25 }
   0x7   : > { %p206_p2 = scmp.eq.s32.totalorder %s637_s30, 1  ;;  %p211_p3 = scmp.ne.s32.totalorder %s806_s25, %s802_s24 }
   0x8   : > { %s1061_s9 = smov (%p34_p0, %s32_s9), 0  ;;  %p212_p5 = scmp.eq.s32.totalorder %s638_s8, 1 }
   0x9   : > { %p912_p4 = por %p206_p2, %p205_p1  ;;  %s190_s12 = ssub.s32 %s818_s28, %s1061_s9 }
   0xa   : > { %p641_p6 = scmp.ge.s32.totalorder %s822_s29, 1  ;;  %p193_p7 = scmp.eq.s32.totalorder %s190_s12, 0 }
   0xb   : > { %p919_p8 = por %p212_p5, %p211_p3  ;;  %p258_p9 = scmp.lt.s32.totalorder %s822_s29, 3 }
   0xc   : > { %s925_s14 = scalar_select %p193_p7, %s810_s26, %s195_s10  }
   0xd   : > { %p259_p10 = pnand %p641_p6, %p258_p9 }
   0xe   : > { %p292_p11 = scmp.lt.s32.totalorder (!%p259_p10), %s814_s27, 1  ;;  %vm304_vm0 = vcmask (!%p259_p10), 25600   ;;  %v824_v0 = vmov (!%p259_p10), 0   ;;  %s825_s20 = smov (!%p259_p10), 4   ;;  %v826_v3 = vmov (!%p259_p10), 0.0   ;;  %vm314_vm1 = vcmask (!%p259_p10), 31744  }
   0xf   : > { %262 = sbr.rel (%p259_p10) target bundleno = 968 (0x3c8), region = 48  ;;  %305 = vst.msk [vmem:[#allocation2] sm:$0x3] (!%p259_p10), %vm304_vm0, %v824_v0  ;;  %742 = vset.pattern.permute.xlu1 (!%p259_p10), %v824_v0  ;;  %743 = vset.pattern.permute.xlu0 (!%p259_p10), %v824_v0  ;;  %vm827_vm2 = vmmov (!%p259_p10), 0   ;;  %s828_s21 = smov (!%p259_p10), 126   ;;  %v342_v11 = vld [vmem:[%s1047_s2] sm:$0xff] (!%p259_p10)  ;;  %v535_v36 = vlaneseq (!%p259_p10) }
  0x10   : > { %660 = vmatprep.subr.bf16.mxu0 (!%p259_p10), %v826_v3  ;;  %666 = vmatprep.subr.bf16.mxu1 (!%p259_p10), %v826_v3  ;;  %s829_s22 = smov (!%p259_p10), 124   ;;  %vm325_vm3 = vcmask (!%p259_p10), 1031168   ;;  %vm333_vm4 = vcmask (!%p259_p10), 1014784   ;;  %vm335_vm5 = vcmask (!%p259_p10), 1041408   ;;  %vm338_vm6 = vcmask (!%p259_p10), 1043456   ;;  %v421_v43 = vld [vmem:[%s1049_s4] sm:$0xff] (!%p259_p10) }
  0x11   : > { %662 = vmatprep.mubr.msk.bf16.mxu0 (!%p259_p10), %vm827_vm2, %v826_v3  ;;  %670 = vmatprep.mubr.msk.bf16.mxu1 (!%p259_p10), %vm827_vm2, %v826_v3  ;;  %vm352_vm7 = vcmask (!%p259_p10), 1045504   ;;  %v341_v21 = vld [vmem:[%s1046_s1] sm:$0xf] (!%p259_p10)  ;;  %vm348_vm8 = vcmask (!%p259_p10), 97280   ;;  %vm306_vm9 = vcmask (!%p259_p10), 27648   ;;  %v536_v41 = vshrl.u32 (!%p259_p10), %v535_v36, 7 }
  0x12   : > { %307 = vst.msk [vmem:[#allocation3] sm:$0xf] (!%p259_p10), %vm306_vm9, %v824_v0  ;;  %v475_v31 = vld [vmem:[%s1050_s5] sm:$0xf] (!%p259_p10)  ;;  %v830_v34 = vmov (!%p259_p10), 1983009808  }
  0x13   : > { %v533_v35 = vunpack.c.l.s4 (!%p259_p10), %v830_v34  ;;  %v476_v45 = vld [vmem:[%s1051_s6] sm:$0xff] (!%p259_p10)  ;;  %vm427_vm10 = vcmask (!%p259_p10), 195584   ;;  %s649_s30 = sshll.u32 (!%p259_p10), %s814_s27, 6 }
  0x14   : > { %v420_v54 = vld [vmem:[%s1048_s3] sm:$0xf] (!%p259_p10) }
  0x15   : > { %v534_v40 = vunpack.c.0.s8 (!%p259_p10), %v533_v35 }
  0x16   : > { %s293_s15 = scalar_select %p292_p11, %s814_s27, 1  ;;  %v310_v4 = vld [vmem:[#allocation2] sm:$0x3] }
  0x17   : > { %v537_v42 = vsub.s32 %v534_v40, %v536_v41  ;;  %s831_s27 = smov [#allocation4]  }
  0x18   : > { %s643_s16 = sshll.u32 %s293_s15, 2 }
  0x19   : > { %s298_s19 = scalar_lea.vmem %s1045_s0, %s643_s16  ;;  %v397_v32 = vld [vmem:[#allocation3] sm:$0xf]  ;;  %s998_s16 = scalar_lea.hbm %s1052_s7, %s649_s30 }
  0x1a   : > { %v308_v1 = vld [vmem:[%s298_s19] sm:$0xf]  ;;  %s748_s19 = sshll.u32 %s831_s27, 4  ;;  %s749_s19 = int_to_ptr.vmem [resolvable:$false] %s748_s19 }
  0x1b   : > { %v933_v2 = vpack.c.bf16 %v308_v1, %v308_v1 }
  0x1d   : > { %312 = vrot.lane.b32.xlu0 %v933_v2, %s825_s20  ;;  %v486_v30 = vsel %vm335_vm5, %v933_v2, 0  ;;  %v538_v44 = vrot.slane %v933_v2, %v537_v42 }
  0x8f   : > { %v313_v5 = vpop.permute.xlu0 %312 }
  0x90   : > { %v317_v6 = vsel %vm314_vm1, %v310_v4, %v313_v5  ;;  %v320_v7 = vrot.slane %v313_v5, 6  ;;  %v328_v10 = vrot.slane %v313_v5, 4 }
  0x91   : > { %v319_v8 = vrot.slane %v317_v6, 6  ;;  %v327_v9 = vrot.slane %v317_v6, 4 }
  0x92   : > { %323 = vrot.lane.b32.xlu1 %v320_v7, %s828_s21 }
  0x93   : > { %321 = vrot.lane.b32.xlu0 %v319_v8, %s828_s21 }
  0x96   : > { %329 = vrot.lane.b32.xlu1 %v327_v9, %s829_s22 }
  0x97   : > { %331 = vrot.lane.b32.xlu0 %v328_v10, %s829_s22 }
  0x9a   : > { %345 = vperm.xlu1 %742, %v342_v11  }
 0x104   : > { %v324_v12 = vpop.permute.xlu1 %323 }
 0x105   : > { %v322_v13 = vpop.permute.xlu0 %321 }
 0x106   : > { %v326_v14 = vsel %vm325_vm3, %v322_v13, %v324_v12 }
 0x107   : > { %v337_v18 = vsel %vm335_vm5, %v317_v6, %v326_v14 }
 0x108   : > { %v330_v15 = vpop.permute.xlu1 %329 }
 0x109   : > { %v332_v16 = vpop.permute.xlu0 %331 }
 0x10a   : > { %v334_v17 = vsel %vm333_vm4, %v330_v15, %v332_v16 }
 0x10b   : > { %v340_v19 = vsel %vm338_vm6, %v337_v18, %v334_v17 }
 0x10c   : > { %v353_v20 = vsel %vm352_vm7, %v340_v19, 0 }
 0x10d   : > { %661 = vmatpush3.bf16.msra.mxu0 %v353_v20 }
 0x10e   : > { %674 = vmatprep.subr.bf16.mxu0 %v826_v3 }
 0x110   : > { %663 = vmatmul.mubr.msk.bf16.vlgmr.msra.gmra.mrb[0].mxu0 %vm348_vm8, %v341_v21 }
 0x111   : > { %676 = vmatprep.mubr.msk.bf16.mxu0 %vm827_vm2, %v826_v3  ;;  %675 = vmatpush3.bf16.msra.mxu0 %v486_v30 }
 0x118   : > { %677 = vmatmul.mubr.msk.bf16.vlgmr.msra.gmra.mrb[4].mxu0 %vm314_vm1, %v475_v31 }
 0x119   : > { %v346_v22 = vpop.permute.xlu1 %345 }
 0x1e3   : > { %v389_v23 = vpop.f32.mrb[0].mxu0 }
 0x1e4   : > { %v390_v24 = vadd.f32 %v389_v23, %v346_v22  ;;  %v664_v25 = vpop.f32.mrb[1].mxu0 }
 0x1e5   : > { %v392_v26 = vpop.f32.mrb[2].mxu0 }
 0x1e6   : > { %v395_v27 = vmax.f32 %v390_v24, 0.0  ;;  %v665_v28 = vpop.f32.mrb[3].mxu0 }
 0x1e8   : > { %v396_v29 = vpack.c.bf16 %v395_v27, %v395_v27 }
 0x1ea   : > { %399 = vrot.lane.b32.xlu0 %v396_v29, %s825_s20 }
 0x1eb   : > { %v522_v58 = vpop.f32.mrb[4].mxu0 }
 0x1ec   : > { %v678_v59 = vpop.f32.mrb[5].mxu0 }
 0x1ed   : > { %v525_v60 = vpop.f32.mrb[6].mxu0 }
 0x1ee   : > { %v679_v61 = vpop.f32.mrb[7].mxu0 }
 0x25c   : > { %v400_v33 = vpop.permute.xlu0 %399 }
 0x25d   : > { %v403_v37 = vsel %vm314_vm1, %v397_v32, %v400_v33  ;;  %v406_v38 = vrot.slane %v400_v33, 4 }
 0x25e   : > { %v405_v39 = vrot.slane %v403_v37, 4 }
 0x25f   : > { %409 = vrot.lane.b32.xlu0 %v406_v38, %s828_s21 }
 0x260   : > { %407 = vrot.lane.b32.xlu1 %v405_v39, %s828_s21 }
 0x263   : > { %414 = vrot.lane.b32.xlu0 %v400_v33, %s829_s22 }
 0x264   : > { %412 = vrot.lane.b32.xlu1 %v403_v37, %s829_s22  ;;  %s289_s22 = sand.u32 1, %s806_s25  }
 0x265   : > { %s642_s23 = sshll.u32 %s289_s22, 2  ;;  %s552_s17 = scalar_lea.sflag [#allocation5], %s289_s22 }
 0x266   : > { %s291_s8 = scalar_lea.vmem [#allocation4], %s642_s23 }
 0x267   : > { %479 = vperm.xlu0 %743, %v476_v45   ;;  %s566_s10 = sshll.u32 %s291_s8, 4  ;;  %s1000_s10 = int_to_ptr.vmem [resolvable:$true] %s566_s10 }
 0x268   : > { %424 = vperm.xlu1 %742, %v421_v43   ;;  %s744_s18 = scalar_lea.vmem %s1000_s10, 64  ;;  %p751_p1 = scmp.lt.s32.totalorder %s1000_s10, %s749_s19 }
 0x269   : > { %p745_p12 = scmp.ne.s32.totalorder %s1000_s10, %s744_s18 }
 0x26b   : > { %p746_p13 = pnand %p745_p12, %p912_p4 }
 0x26c   : > { %539 = vrot.lane.b32.xlu1 %v538_v44, %s825_s20 }
 0x26d   : > { %p747_p0 = pneg %p746_p13 }
 0x270   : > { %546 = vrot.lane.b32.xlu1 %v396_v29, %s825_s20  ;;  %s750_s20 = scalar_lea.vmem %s749_s19, 128 }
 0x271   : > { %p752_p2 = scmp.lt.s32.totalorder %s750_s20, %s744_s18 }
 0x273   : > { %p753_p3 = por %p752_p2, %p751_p1 }
 0x275   : > { %p754_p5 = pnand %p753_p3, %p747_p0 }
 0x2d1   : > { %v410_v46 = vpop.permute.xlu0 %409 }
 0x2d2   : > { %v408_v47 = vpop.permute.xlu1 %407 }
 0x2d3   : > { %v411_v48 = vsel %vm325_vm3, %v408_v47, %v410_v46 }
 0x2d4   : > { %v418_v49 = vsel %vm338_vm6, %v403_v37, %v411_v48 }
 0x2d5   : > { %667 = vmatpush3.bf16.msra.mxu1 %v418_v49  ;;  %v415_v50 = vpop.permute.xlu0 %414 }
 0x2d6   : > { %v413_v51 = vpop.permute.xlu1 %412  ;;  %668 = vmatprep.subr.bf16.mxu1 %v826_v3 }
 0x2d7   : > { %v416_v52 = vsel %vm333_vm4, %v413_v51, %v415_v50 }
 0x2d8   : > { %v432_v53 = vsel %vm338_vm6, %v416_v52, 0 }
 0x2d9   : > { %669 = vmatpush3.bf16.msra.mxu1 %v432_v53 }
 0x2dc   : > { %671 = vmatmul.mubr.msk.bf16.vlgmr.msra.gmra.mrb[0].mxu1 %vm427_vm10, %v420_v54 }
 0x2e6   : > { %v480_v62 = vpop.permute.xlu0 %479 }
 0x2e7   : > { %v425_v55 = vpop.permute.xlu1 %424  ;;  %v523_v2 = vadd.f32 %v522_v58, %v480_v62 }
 0x2eb   : > { %v540_v56 = vpop.permute.xlu1 %539 }
 0x2ec   : > { %543 = vst.msk [vmem:[#allocation2] sm:$0x3] %vm304_vm0, %v540_v56 }
 0x2ef   : > { %v547_v57 = vpop.permute.xlu1 %546 }
 0x2f0   : > { %550 = vst.msk [vmem:[#allocation3] sm:$0xf] %vm306_vm9, %v547_v57 }
 0x3af   : > { %v468_v63 = vpop.f32.mrb[0].mxu1 }
 0x3b0   : > { %v469_v0 = vadd.f32 %v468_v63, %v425_v55  ;;  %v672_v1 = vpop.f32.mrb[1].mxu1 }
 0x3b1   : > { %v471_v3 = vpop.f32.mrb[2].mxu1 }
 0x3b2   : > { %v474_v4 = vmax.f32 %v469_v0, 0.0  ;;  %v673_v5 = vpop.f32.mrb[3].mxu1 }
 0x3b4   : > { %v528_v6 = vadd.f32 %v523_v2, %v474_v4 }
 0x3b6   : > { %v529_v7 = vmax.f32 %v528_v6, 0.0 }
 0x3b8   : > { %v530_v8 = vpack.c.bf16 %v529_v7, %v529_v7 }
 0x3ba   : > { %531 = vst [vmem:[%s291_s8] sm:$0xf] %v530_v8 }
 0x3bb   : > { %757 = shalt.err (!%p754_p5)
}
 0x3bc   : > { %s758_s21 = scalar_lea.hbm %s998_s16, 64  ;;  %s762_s30 = scalar_lea.hbm %s1052_s7, 128 }
 0x3bd   : > { %p759_p6 = scmp.ne.s32.totalorder %s998_s16, %s758_s21  ;;  %p763_p10 = scmp.lt.u32.totalorder %s998_s16, %s1052_s7 }
 0x3be   : > { %p764_p11 = scmp.lt.u32.totalorder %s762_s30, %s758_s21  ;;  %p766_p13 = scmp.lt.u32.totalorder %s758_s21, %s998_s16 }
 0x3bf   : > { %p760_p7 = pnand %p759_p6, %p912_p4 }
 0x3c0   : > { %p765_p12 = por %p764_p11, %p763_p10 }
 0x3c1   : > { %p761_p9 = pneg %p760_p7 }
 0x3c2   : > { %p767_p0 = por %p766_p13, %p765_p12 }
 0x3c4   : > { %p768_p1 = pnand %p767_p0, %p761_p9 }
 0x3c6   : > { %771 = shalt.err (!%p768_p1)
}
 0x3c7   : > { %680 = dma.vmem_to_hbm [thread:$0]  (%p912_p4), %s1000_s10, 64, %s998_s16, %s552_s17  }
 0x3c8 PF: > { %p686_p2 = scmp.ge.s32.totalorder %s822_s29, 2  ;;  %s578_s15 = sand.u32 1, %s802_s24  }
 0x3c9   : > { %s579_s18 = scalar_lea.sflag [#allocation5], %s578_s15 }
 0x3ca   : > { %p683_p3 = pnand %p686_p2, %p919_p8 }
 0x3cc   : > { %797 = dma.done.wait (!%p683_p3), %s579_s18, 64  }
 0x3cd   : > { %799 = vsyncadd (!%p683_p3), %s579_s18, 4294967232  ;;  %s20_s29 = sadd.s32 1, %s822_s29   ;;  %s1055_s24 = smov %s806_s25 }
 0x3ce   : > { %p17_p5 = scmp.ge.s32.totalorder %s20_s29, 4   ;;  %s1056_s25 = smov %s810_s26 }
 0x3cf   : > { %s1057_s26 = smov %s925_s14  ;;  %s1058_s27 = smov %s818_s28 }
 0x3d0   : > { %s1059_s28 = smov %s1061_s9  ;;  %19 = sbr.rel (!%p17_p5) target bundleno = 4 (0x4), region = 87 }
 0x3d7   :  { %584 = vsyncpa [#allocation5], 1 }
 0x3d8   :  { %586 = vsyncpa [#allocation5 + $0x1], 1 }

</bundles_post_ra>
